<compile_context>
chip_gen: v5e
topology: v5e:2x2
jax: 0.10.0
libtpu: 0.0.40
codegen_flags: <defaults>
</compile_context>

<pallas_src>
import numpy as np
import jax
import jax.numpy as jnp
from jax import lax
from jax.experimental import pallas as pl
from jax.experimental.pallas import tpu as pltpu

NEG_SLOPE = 0.01                       # F.leaky_relu default negative_slope
_NT_DIMS = (((1,), (1,)), ((), ()))    # contract last dims of both (A @ B^T)


def _leaky_relu(x):
    return jnp.where(x > 0, x, NEG_SLOPE * x)


def _round_up(x, m):
    return ((x + m - 1) // m) * m


def _cdiv(a, b):
    return -(-a // b)


def critic_kernel(s_ref, a_ref,
                  w1_ref, b1_ref,
                  w2s_ref, w2a_ref, b2_ref,
                  w3_ref, b3_ref,
                  q_ref):
    """One batch tile: q[1, TB] = fc3(leaky(fc2(cat(leaky(fc1(s)), a))))."""
    wdt = w1_ref.dtype  # MXU input dtype for the big matmuls (f32 or bf16)

    # fc1: [TB, S] @ [S, F1] + [1, F1], f32 accumulation on the MXU.
    # Activations arrive f32; the (optional) bf16 cast happens here in-kernel
    # (free VPU work hidden under the DMA), never in the wrapper.
    s = s_ref[...].astype(wdt)
    h1 = jnp.dot(s, w1_ref[...], preferred_element_type=jnp.float32) + b1_ref[...]
    h1 = _leaky_relu(h1)

    # fc2 on concat([h1, action]) == h1 @ W2[:F1] + action @ W2[F1:]  (exact).
    # The action part stays f32 (tiny K=4 contraction, better precision).
    h2 = (jnp.dot(h1.astype(wdt), w2s_ref[...],
                  preferred_element_type=jnp.float32)
          + jnp.dot(a_ref[...], w2a_ref[...],
                    preferred_element_type=jnp.float32)
          + b2_ref[...])
    h2 = _leaky_relu(h2)

    # fc3 (out_features == 1), lane-dense: NT matmul contracting F2 so the
    # result lands as a [*, TB] row (batch on lanes) instead of a [TB, 1]
    # column of masked single-lane stores.  w3 is replicated to 8 sublanes
    # (free) to keep the MXU M-dim at the sublane granule; row 0 is stored.
    w3_8 = jnp.broadcast_to(w3_ref[...], (8, w3_ref.shape[1]))
    q8 = lax.dot_general(w3_8, h2.astype(jnp.float32), _NT_DIMS,
                         preferred_element_type=jnp.float32)
    q_ref[...] = q8[0:1, :] + b3_ref[...]


def cast_params_for_mxu(params, dtype=jnp.bfloat16):
    """Pre-cast the two large matmul weights ONCE (call outside the hot path).

    Biases, the action weight slice (K=4) and the fc3 row stay f32.
    """
    w1, b1, w2s, w2a, b2, w3_row, b3 = params
    return (w1.astype(dtype), b1, w2s.astype(dtype), w2a, b2, w3_row, b3)


def critic_forward(state, action, params, *, block_b=4096):
    """state: [B, S], action: [B, A] -> q: [B, 1] (float32).

    Activations are passed as-is (f32) and cast to the weight dtype inside the
    kernel; pass params through cast_params_for_mxu once for the bf16 path.
    """
    if state.ndim == 1:
        state = state[None, :]
    if action.ndim == 1:
        action = action[None, :]

    w1, b1, w2s, w2a, b2, w3_row, b3 = params
    B, S = state.shape
    A = action.shape[1]
    F1 = w1.shape[1]
    F2 = w2s.shape[1]

    # --- batch tiling policy -------------------------------------------------
    # Pad the batch to a multiple of 8 first, then split into grid steps so at
    # most ~(128 * n_steps) rows are padded (never up to a whole tile).  Keep
    # >= 2 grid steps for large batches so the "parallel" axis can use both
    # v7x TensorCores; multi-step tiles are rounded to a multiple of 128 so
    # the lane-dense (1, TB) output block stays 128-aligned.
    B8 = _round_up(B, 8)
    n_steps = _cdiv(B8, block_b)
    if n_steps == 1 and B8 >= 1024:
        n_steps = 2
    TB = B8 if n_steps == 1 else _round_up(_cdiv(B8, n_steps), 128)
    Bp = n_steps * TB

    if Bp != B:
        state = jnp.pad(state, ((0, Bp - B), (0, 0)))
        action = jnp.pad(action, ((0, Bp - B), (0, 0)))

    # --- VMEM budget (double-buffered, lane-padded tiles) + cost estimate ----
    def _tile_bytes(rows, cols, dt):
        return rows * _round_up(cols, 128) * jnp.dtype(dt).itemsize

    vmem_need = 2 * (_tile_bytes(TB, S, state.dtype)
                     + _tile_bytes(TB, A, action.dtype)
                     + _tile_bytes(8, TB, jnp.float32))
    weight_bytes = sum(int(x.size) * x.dtype.itemsize
                       for x in (w1, b1, w2s, w2a, b2, w3_row, b3))
    vmem_need += 2 * weight_bytes
    # Explicit limit: v5e's default scoped VMEM is only 16 MiB; stay well
    # under v7x's 64 MiB physical VMEM.
    vmem_limit = int(min(max(32 << 20, vmem_need + (4 << 20)), 56 << 20))

    flops = 2 * Bp * (S * F1 + F1 * F2 + A * F2 + F2)
    bytes_accessed = int(
        Bp * (S * state.dtype.itemsize + A * action.dtype.itemsize)   # acts in
        + Bp * 4                                                      # q out
        + weight_bytes)

    # --- pallas_call ----------------------------------------------------------
    def batch_spec(cols):
        return pl.BlockSpec((TB, cols), lambda i: (i, 0))

    def resident(arr):  # weights/biases: same block every step -> stay in VMEM
        return pl.BlockSpec(arr.shape, lambda i: (0, 0))

    out = pl.pallas_call(
        critic_kernel,
        out_shape=jax.ShapeDtypeStruct((1, Bp), jnp.float32),
        grid=(n_steps,),
        in_specs=[batch_spec(S), batch_spec(A),
                  resident(w1), resident(b1),
                  resident(w2s), resident(w2a), resident(b2),
                  resident(w3_row), resident(b3)],
        out_specs=pl.BlockSpec((1, TB), lambda i: (0, i)),   # lane-dense row
        compiler_params=pltpu.CompilerParams(
            dimension_semantics=("parallel",),
            vmem_limit_bytes=vmem_limit),
        cost_estimate=pl.CostEstimate(
            flops=flops, transcendentals=0, bytes_accessed=bytes_accessed),
    )(state, action, w1, b1, w2s, w2a, b2, w3_row, b3)

    return out[0, :B].reshape(B, 1)


def init_critic_params(key, state_size, action_size, fc1_units=64, fc2_units=32):
    """Deterministic init mirroring Critic.__init__ / reset_parameters.

    PyTorch Linear stores weight as [out, in]; we build the transposed
    [in, out] layout the kernel expects (fc3 stays as its natural [1, F2]
    row).  hidden_init uses 1/sqrt(weight.size()[0]) == 1/sqrt(out_features)
    (quirk of the reference); fc3 weights are U(-3e-3, 3e-3); biases use
    PyTorch's default U(-1/sqrt(in_features), 1/sqrt(in_features)).
    """
    k = jax.random.split(key, 6)
    f32 = jnp.float32

    lim1 = 1.0 / np.sqrt(fc1_units)
    w1 = jax.random.uniform(k[0], (state_size, fc1_units), f32, -lim1, lim1)
    b1 = jax.random.uniform(k[1], (1, fc1_units), f32,
                            -1.0 / np.sqrt(state_size), 1.0 / np.sqrt(state_size))

    lim2 = 1.0 / np.sqrt(fc2_units)
    w2_full = jax.random.uniform(k[2], (fc1_units + action_size, fc2_units),
                                 f32, -lim2, lim2)
    w2s = w2_full[:fc1_units]      # multiplies the fc1-hidden part of the concat
    w2a = w2_full[fc1_units:]      # multiplies the action part of the concat
    b2_lim = 1.0 / np.sqrt(fc1_units + action_size)
    b2 = jax.random.uniform(k[3], (1, fc2_units), f32, -b2_lim, b2_lim)

    w3_row = jax.random.uniform(k[4], (1, fc2_units), f32, -3e-3, 3e-3)
    b3_lim = 1.0 / np.sqrt(fc2_units)
    b3 = jax.random.uniform(k[5], (1, 1), f32, -b3_lim, b3_lim)

    return (w1, b1, w2s, w2a, b2, w3_row, b3)


def critic_reference(state, action, params):
    """Pure-JAX reference mirroring the PyTorch forward."""
    w1, b1, w2s, w2a, b2, w3_row, b3 = params
    x = _leaky_relu(state @ w1 + b1)
    x = jnp.concatenate([x, action], axis=1)
    w2 = jnp.concatenate([w2s, w2a], axis=0)
    x = _leaky_relu(x @ w2 + b2)
    return x @ w3_row.T + b3


if __name__ == "__main__":
    state_size, action_size = 24, 4
    fc1_units, fc2_units = 64, 32

    key = jax.random.PRNGKey(0)
    k_params, k_state, k_action = jax.random.split(key, 3)
    params = init_critic_params(k_params, state_size, action_size,
                                fc1_units, fc2_units)

    # --- small batch: single grid step, TB == batch ---
    batch = 8
    state = jax.random.normal(k_state, (batch, state_size), jnp.float32)
    action = jax.random.normal(k_action, (batch, action_size), jnp.float32)

    q = jax.block_until_ready(critic_forward(state, action, params))
    q_ref = critic_reference(state, action, params)
    np.testing.assert_allclose(np.asarray(q), np.asarray(q_ref),
                               rtol=1e-4, atol=1e-4)
    assert q.shape == (batch, 1)

    # --- larger batch: >=2 grid steps (dual-TC on v7x) + row padding ---
    big_batch = 3000
    k_s2, k_a2 = jax.random.split(jax.random.PRNGKey(1))
    state_big = jax.random.normal(k_s2, (big_batch, state_size), jnp.float32)
    action_big = jax.random.normal(k_a2, (big_batch, action_size), jnp.float32)

    q_big = jax.block_until_ready(critic_forward(state_big, action_big, params))
    q_big_ref = critic_reference(state_big, action_big, params)
    np.testing.assert_allclose(np.asarray(q_big), np.asarray(q_big_ref),
                               rtol=1e-4, atol=1e-4)
    assert q_big.shape == (big_batch, 1)

    # --- many small tiles (explicit block_b override, 12 grid steps) ---
    q_tiles = jax.block_until_ready(
        critic_forward(state_big, action_big, params, block_b=256))
    np.testing.assert_allclose(np.asarray(q_tiles), np.asarray(q_big_ref),
                               rtol=1e-4, atol=1e-4)

    # --- bf16 MXU-weight path: weights pre-cast once, activations cast in-kernel
    params_bf16 = cast_params_for_mxu(params)
    q_bf16 = jax.block_until_ready(
        critic_forward(state_big, action_big, params_bf16))
    np.testing.assert_allclose(np.asarray(q_bf16), np.asarray(q_big_ref),
                               rtol=2e-2, atol=2e-2)

    print("KERNEL_OK")
</pallas_src>

<mosaic_0001>
module attributes {stable_mosaic.version = 11 : i64} {
  func.func @critic_kernel(%arg0: i32, %arg1: memref<8x24xf32, #tpu.memory_space<vmem>>, %arg2: memref<8x4xf32, #tpu.memory_space<vmem>>, %arg3: memref<24x64xf32, #tpu.memory_space<vmem>>, %arg4: memref<1x64xf32, #tpu.memory_space<vmem>>, %arg5: memref<64x32xf32, #tpu.memory_space<vmem>>, %arg6: memref<4x32xf32, #tpu.memory_space<vmem>>, %arg7: memref<1x32xf32, #tpu.memory_space<vmem>>, %arg8: memref<1x32xf32, #tpu.memory_space<vmem>>, %arg9: memref<1x1xf32, #tpu.memory_space<vmem>>, %arg10: memref<1x8xf32, #tpu.memory_space<vmem>>) attributes {dimension_semantics = [#tpu.dimension_semantics<parallel>], iteration_bounds = array<i64: 1>, scalar_prefetch = 0 : i64, scratch_operands = 0 : i64, tpu.core_type = #tpu.core_type<tc>, window_params = [{transform_indices = @transform_0, window_bounds = array<i64: 8, 24>}, {transform_indices = @transform_1, window_bounds = array<i64: 8, 4>}, {pipeline_mode = #tpu.pipeline_mode<synchronous>, transform_indices = @transform_2, window_bounds = array<i64: 24, 64>}, {pipeline_mode = #tpu.pipeline_mode<synchronous>, transform_indices = @transform_3, window_bounds = array<i64: 1, 64>}, {pipeline_mode = #tpu.pipeline_mode<synchronous>, transform_indices = @transform_4, window_bounds = array<i64: 64, 32>}, {pipeline_mode = #tpu.pipeline_mode<synchronous>, transform_indices = @transform_5, window_bounds = array<i64: 4, 32>}, {pipeline_mode = #tpu.pipeline_mode<synchronous>, transform_indices = @transform_6, window_bounds = array<i64: 1, 32>}, {pipeline_mode = #tpu.pipeline_mode<synchronous>, transform_indices = @transform_7, window_bounds = array<i64: 1, 32>}, {pipeline_mode = #tpu.pipeline_mode<synchronous>, transform_indices = @transform_8, window_bounds = array<i64: 1, 1>}, {transform_indices = @transform_9, window_bounds = array<i64: 1, 8>}]} {
    %c0 = arith.constant 0 : index
    %c0_0 = arith.constant 0 : index
    %0 = vector.load %arg1[%c0, %c0_0] : memref<8x24xf32, #tpu.memory_space<vmem>>, vector<8x24xf32>
    %c0_1 = arith.constant 0 : index
    %c0_2 = arith.constant 0 : index
    %1 = vector.load %arg3[%c0_1, %c0_2] : memref<24x64xf32, #tpu.memory_space<vmem>>, vector<24x64xf32>
    %cst = arith.constant dense<0.000000e+00> : vector<8x64xf32>
    %2 = tpu.matmul %0, %1, %cst {dimension_numbers = #tpu.dot_dimension_numbers<[1], [0], [0], [1], [0, 0, 1, 1], [], []>} : vector<8x24xf32>, vector<24x64xf32>, vector<8x64xf32> -> vector<8x64xf32>
    %c0_3 = arith.constant 0 : index
    %c0_4 = arith.constant 0 : index
    %3 = vector.load %arg4[%c0_3, %c0_4] : memref<1x64xf32, #tpu.memory_space<vmem>>, vector<1x64xf32>
    %4 = vector.broadcast %3 : vector<1x64xf32> to vector<8x64xf32>
    %5 = arith.addf %2, %4 : vector<8x64xf32>
    %cst_5 = arith.constant 0.000000e+00 : f32
    %6 = vector.broadcast %cst_5 : f32 to vector<8x64xf32>
    %7 = arith.cmpf ogt, %5, %6 : vector<8x64xf32>
    %cst_6 = arith.constant 0.00999999977 : f32
    %8 = vector.broadcast %cst_6 : f32 to vector<8x64xf32>
    %9 = arith.mulf %8, %5 : vector<8x64xf32>
    %10 = arith.select %7, %5, %9 : vector<8x64xi1>, vector<8x64xf32>
    %c0_7 = arith.constant 0 : index
    %c0_8 = arith.constant 0 : index
    %11 = vector.load %arg5[%c0_7, %c0_8] : memref<64x32xf32, #tpu.memory_space<vmem>>, vector<64x32xf32>
    %cst_9 = arith.constant dense<0.000000e+00> : vector<8x32xf32>
    %12 = tpu.matmul %10, %11, %cst_9 {dimension_numbers = #tpu.dot_dimension_numbers<[1], [0], [0], [1], [0, 0, 1, 1], [], []>} : vector<8x64xf32>, vector<64x32xf32>, vector<8x32xf32> -> vector<8x32xf32>
    %c0_10 = arith.constant 0 : index
    %c0_11 = arith.constant 0 : index
    %13 = vector.load %arg2[%c0_10, %c0_11] : memref<8x4xf32, #tpu.memory_space<vmem>>, vector<8x4xf32>
    %c0_12 = arith.constant 0 : index
    %c0_13 = arith.constant 0 : index
    %14 = vector.load %arg6[%c0_12, %c0_13] : memref<4x32xf32, #tpu.memory_space<vmem>>, vector<4x32xf32>
    %cst_14 = arith.constant dense<0.000000e+00> : vector<8x32xf32>
    %15 = tpu.matmul %13, %14, %cst_14 {dimension_numbers = #tpu.dot_dimension_numbers<[1], [0], [0], [1], [0, 0, 1, 1], [], []>} : vector<8x4xf32>, vector<4x32xf32>, vector<8x32xf32> -> vector<8x32xf32>
    %16 = arith.addf %12, %15 : vector<8x32xf32>
    %c0_15 = arith.constant 0 : index
    %c0_16 = arith.constant 0 : index
    %17 = vector.load %arg7[%c0_15, %c0_16] : memref<1x32xf32, #tpu.memory_space<vmem>>, vector<1x32xf32>
    %18 = vector.broadcast %17 : vector<1x32xf32> to vector<8x32xf32>
    %19 = arith.addf %16, %18 : vector<8x32xf32>
    %cst_17 = arith.constant 0.000000e+00 : f32
    %20 = vector.broadcast %cst_17 : f32 to vector<8x32xf32>
    %21 = arith.cmpf ogt, %19, %20 : vector<8x32xf32>
    %cst_18 = arith.constant 0.00999999977 : f32
    %22 = vector.broadcast %cst_18 : f32 to vector<8x32xf32>
    %23 = arith.mulf %22, %19 : vector<8x32xf32>
    %24 = arith.select %21, %19, %23 : vector<8x32xi1>, vector<8x32xf32>
    %c0_19 = arith.constant 0 : index
    %c0_20 = arith.constant 0 : index
    %25 = vector.load %arg8[%c0_19, %c0_20] : memref<1x32xf32, #tpu.memory_space<vmem>>, vector<1x32xf32>
    %26 = vector.shape_cast %25 : vector<1x32xf32> to vector<1x32xf32>
    %27 = vector.broadcast %26 : vector<1x32xf32> to vector<8x32xf32>
    %cst_21 = arith.constant dense<0.000000e+00> : vector<8x8xf32>
    %28 = tpu.matmul %27, %24, %cst_21 {dimension_numbers = #tpu.dot_dimension_numbers<[1], [1], [0], [0], [0, 0, 1, 0], [], []>} : vector<8x32xf32>, vector<8x32xf32>, vector<8x8xf32> -> vector<8x8xf32>
    %29 = vector.extract_strided_slice %28 {offsets = [0, 0], sizes = [1, 8], strides = [1, 1]} : vector<8x8xf32> to vector<1x8xf32>
    %c0_22 = arith.constant 0 : index
    %c0_23 = arith.constant 0 : index
    %30 = vector.load %arg9[%c0_22, %c0_23] : memref<1x1xf32, #tpu.memory_space<vmem>>, vector<1x1xf32>
    %31 = vector.broadcast %30 : vector<1x1xf32> to vector<1x8xf32>
    %32 = arith.addf %29, %31 : vector<1x8xf32>
    %c0_24 = arith.constant 0 : index
    %c0_25 = arith.constant 0 : index
    %33 = vector.load %arg10[%c0_24, %c0_25] : memref<1x8xf32, #tpu.memory_space<vmem>>, vector<1x8xf32>
    tpu.vector_store %arg10[%c0_24, %c0_25], %32 {strides = array<i32>} : memref<1x8xf32, #tpu.memory_space<vmem>>, vector<1x8xf32>,
    return
  }
  func.func @transform_0(%arg0: i32) -> (i32, i32) {
    %c0_i32 = arith.constant 0 : i32
    %c0_i32_0 = arith.constant 0 : i32
    return %arg0, %c0_i32 : i32, i32
  }
  func.func @transform_1(%arg0: i32) -> (i32, i32) {
    %c0_i32 = arith.constant 0 : i32
    %c0_i32_0 = arith.constant 0 : i32
    return %arg0, %c0_i32 : i32, i32
  }
  func.func @transform_2(%arg0: i32) -> (i32, i32) {
    %c0_i32 = arith.constant 0 : i32
    %c0_i32_0 = arith.constant 0 : i32
    %c0_i32_1 = arith.constant 0 : i32
    return %c0_i32, %c0_i32_0 : i32, i32
  }
  func.func @transform_3(%arg0: i32) -> (i32, i32) {
    %c0_i32 = arith.constant 0 : i32
    %c0_i32_0 = arith.constant 0 : i32
    %c0_i32_1 = arith.constant 0 : i32
    return %c0_i32, %c0_i32_0 : i32, i32
  }
  func.func @transform_4(%arg0: i32) -> (i32, i32) {
    %c0_i32 = arith.constant 0 : i32
    %c0_i32_0 = arith.constant 0 : i32
    %c0_i32_1 = arith.constant 0 : i32
    return %c0_i32, %c0_i32_0 : i32, i32
  }
  func.func @transform_5(%arg0: i32) -> (i32, i32) {
    %c0_i32 = arith.constant 0 : i32
    %c0_i32_0 = arith.constant 0 : i32
    %c0_i32_1 = arith.constant 0 : i32
    return %c0_i32, %c0_i32_0 : i32, i32
  }
  func.func @transform_6(%arg0: i32) -> (i32, i32) {
    %c0_i32 = arith.constant 0 : i32
    %c0_i32_0 = arith.constant 0 : i32
    %c0_i32_1 = arith.constant 0 : i32
    return %c0_i32, %c0_i32_0 : i32, i32
  }
  func.func @transform_7(%arg0: i32) -> (i32, i32) {
    %c0_i32 = arith.constant 0 : i32
    %c0_i32_0 = arith.constant 0 : i32
    %c0_i32_1 = arith.constant 0 : i32
    return %c0_i32, %c0_i32_0 : i32, i32
  }
  func.func @transform_8(%arg0: i32) -> (i32, i32) {
    %c0_i32 = arith.constant 0 : i32
    %c0_i32_0 = arith.constant 0 : i32
    %c0_i32_1 = arith.constant 0 : i32
    return %c0_i32, %c0_i32_0 : i32, i32
  }
  func.func @transform_9(%arg0: i32) -> (i32, i32) {
    %c0_i32 = arith.constant 0 : i32
    %c0_i32_0 = arith.constant 0 : i32
    return %c0_i32, %arg0 : i32, i32
  }
}

</mosaic_0001>

<bundles_post_ra>
// kernel: tpu_custom_call.1
= control target key start
LH: loop header
LB: loop body
LE: loop exit
PB: predicated region body
PF: predicated region fallthrough
CT: control target
= control target key end

     0   :  { %s342_s0 = inlined_call_operand.vmem [shape: f32[8,24], index: 0, kind: input, shape index: {}]   ;;  %s343_s1 = inlined_call_operand.vmem [shape: f32[8,4], index: 1, kind: input, shape index: {}]   ;;  %s344_s2 = inlined_call_operand.vmem [shape: f32[24,64], index: 2, kind: input, shape index: {}]   ;;  %s345_s3 = inlined_call_operand.vmem [shape: f32[1,64], index: 3, kind: input, shape index: {}]   ;;  %s346_s4 = inlined_call_operand.vmem [shape: f32[64,32], index: 4, kind: input, shape index: {}]   ;;  %s347_s5 = inlined_call_operand.vmem [shape: f32[4,32], index: 5, kind: input, shape index: {}]   ;;  %s348_s6 = inlined_call_operand.vmem [shape: f32[1,32], index: 6, kind: input, shape index: {}]   ;;  %s349_s7 = inlined_call_operand.vmem [shape: f32[1,32], index: 7, kind: input, shape index: {}]   ;;  %s350_s8 = inlined_call_operand.<no memory space> [shape: f32[1,1], index: 8, kind: input, shape index: {}]   ;;  %s351_s9 = inlined_call_operand.hbm [shape: f32[1,8], index: 9, kind: output, shape index: {}]  }
   0x1   :  { %v14_v0 = vstv %s350_s8 }
   0x2   :  { %15 = vst [vmem:[#allocation2] sm:$0x1] %v14_v0 }
   0x3   :  { %v38_v1 = vld [vmem:[%s344_s2 + $0x10] sm:$0xff]  ;;  %v37_v2 = vld [vmem:[%s344_s2 + $0x8] sm:$0xff]  ;;  %v77_v3 = vld [vmem:[%s346_s4 + $0x38] sm:$0xff]  ;;  %vm43_vm0 = vcmask 195584  }
   0x4   :  { %60 = vmatpush.msra.mxu0 %v38_v1  ;;  %v76_v4 = vld [vmem:[%s346_s4 + $0x30] sm:$0xff]  ;;  %v36_v5 = vld [vmem:[%s344_s2] sm:$0xff]  ;;  %120 = vmatpush.msra.mxu2 %v77_v3  ;;  %v75_v7 = vld [vmem:[%s346_s4 + $0x28] sm:$0xff] }
   0x5   :  { %v35_v6 = vld [vmem:[%s342_s0] sm:$0xff] }
   0x6   :  { %61 = vmatpush.msra.mxu0 %v37_v2  ;;  %121 = vmatpush.msra.mxu2 %v76_v4 }
   0x7   :  { %16 = vsyncpa [#allocation4], 0  ;;  %v74_v8 = vld [vmem:[%s346_s4 + $0x20] sm:$0xff]  ;;  %v73_v9 = vld [vmem:[%s346_s4 + $0x18] sm:$0xff]  ;;  %vm84_vm1 = vcmask 1043456   ;;  %vm80_vm2 = vcmask 31744  }
   0x8   :  { %62 = vmatpush.msra.mxu0 %v36_v5  ;;  %122 = vmatpush.msra.mxu2 %v75_v7  ;;  %v72_v10 = vld [vmem:[%s346_s4 + $0x10] sm:$0xff]  ;;  %v71_v11 = vld [vmem:[%s346_s4 + $0x8] sm:$0xff]  ;;  %v70_v12 = vld [vmem:[%s346_s4] sm:$0xff]  ;;  %vm108_vm4 = vcmask 523264   ;;  %v233_v21 = vmov 0   ;;  %vm143_vm6 = vcmask 261120  }
   0x9   :  { %195 = vmatmul.msk.f32.vlgmr.msra.gmra.mxu0 %vm43_vm0, %v35_v6  ;;  %v79_v13 = vld [vmem:[%s347_s5] sm:$0xf]  ;;  %203 = vset.pattern.permute.xlu0 %v233_v21  ;;  %s234_s17 = smov [#allocation3]   ;;  %vm177_vm7 = vcmask 57344  }
   0xa   :  { %123 = vmatpush.msra.mxu2 %v74_v8  ;;  %v78_v14 = vld [vmem:[%s343_s1] sm:$0xff]  ;;  %196 = vmatpush.msk.msra.mxu1 %vm84_vm1, %v79_v13  ;;  %s184_s18 = sshll.u32 %s234_s17, 4  ;;  %s185_s18 = int_to_ptr.vmem [resolvable:$true] %s184_s18 }
   0xb   :  { %197 = vmatmul.msk.f32.vlgmr.msra.gmra.mxu1 %vm80_vm2, %v78_v14  ;;  %v204_v15 = vld [vmem:[%s345_s3] ss:$0 sm:$0xff] }
   0xc   :  { %124 = vmatpush.msra.mxu2 %v73_v9  ;;  %v169_v20 = vld [vmem:[#allocation2] sm:$0x1] }
   0xd   :  { %172 = vperm.xlu0 %203, %v169_v20   ;;  %v205_v23 = vld [vmem:[%s348_s6] ss:$0 sm:$0xff]  ;;  %s186_s6 = sshll.u32 %s351_s9, 4  ;;  %s187_s6 = int_to_ptr.hbm [resolvable:$true] %s186_s6 }
   0xe   :  { %125 = vmatpush.msra.mxu2 %v72_v10  ;;  %v206_v29 = vld [vmem:[%s349_s7] ss:$0 sm:$0xff] }
  0x10   :  { %126 = vmatpush.msra.mxu2 %v71_v11 }
  0x12   :  { %127 = vmatpush.msra.mxu2 %v70_v12 }
  0x7f   :  { %v173_v30 = vpop.permute.xlu0 %172 }
  0x80   :  { %v175_v31 = vperm.slane %v173_v30, 0 }
  0x86   :  { %v64_v16 = vpop.f32.mrf.mxu0 }
  0x87   :  { %v65_v17 = vadd.f32 %v204_v15, %v64_v16 }
  0x88   :  { %v105_v22 = vpop.f32.mrf.mxu1 }
  0x89   :  { %v68_v18 = vmul.f32 0.01, %v65_v17  ;;  %vm67_vm3 = vcmp.gt.f32.partialorder %v65_v17, 0.0 }
  0x8b   :  { %v69_v19 = vsel %vm67_vm3, %v65_v17, %v68_v18 }
  0x8c   :  { %198 = vmatmul.msk.f32.vlgmr.msra.gmra.mxu2 %vm108_vm4, %v69_v19 }
 0x10f   :  { %v129_v24 = vpop.f32.mrf.mxu2 }
 0x110   :  { %v130_v25 = vadd.f32 %v129_v24, %v105_v22 }
 0x112   :  { %v136_v26 = vadd.f32 %v205_v23, %v130_v25 }
 0x114   :  { %vm137_vm5 = vcmp.gt.f32.partialorder %v136_v26, 0.0  ;;  %v138_v27 = vmul.f32 0.01, %v136_v26 }
 0x116   :  { %v139_v28 = vsel %vm137_vm5, %v136_v26, %v138_v27 }
 0x117   :  { %199 = vmatpush.xpose.msk.msra.mxu3 %vm143_vm6, %v139_v28 }
 0x11a   :  { %200 = vmatmul.msk.f32.vlgmr.msra.gmra.mxu3 %vm143_vm6, %v206_v29 }
 0x19d   :  { %v166_v32 = vpop.f32.mrf.mxu3 }
 0x19e   :  { %v176_v33 = vadd.f32 %v175_v31, %v166_v32 }
 0x1a0   :  { %178 = vst.msk [vmem:[#allocation3] sm:$0x1] %vm177_vm7, %v176_v33 }
 0x1a1   :  { %189 = dma.vmem_to_hbm [thread:$0]  %s185_s18, 16, %s187_s6, [#allocation4]  }
 0x1a2   :  { %231 = dma.done.wait [#allocation4], 16  }
 0x1a3   :  { %232 = vsyncadd [#allocation4], 4294967280 }
 0x1a4   :  { %194 = vsyncpa [#allocation4], 1 }

</bundles_post_ra>
